<compile_context>
chip_gen: v7x
topology: tpu7x:2x2x1
jax: 0.10.0
libtpu: 0.0.40
codegen_flags: <defaults>
</compile_context>

<pallas_src>
import functools

import jax
import jax.numpy as jnp
from jax.experimental import pallas as pl
from jax.experimental.pallas import tpu as pltpu

_NEG_BIG = -1e30  # "minus infinity" that keeps max()/exp() arithmetic NaN-free


def _supcon_kernel(row_lbl_ref, col_lbl_ref, col_bias_ref, pos_cnt_ref,
                   a_ref, c_ref, out_ref,
                   m_run, l_run, pos_dot,
                   *, scale, contrast_resident):
    ri = pl.program_id(0)
    ci = pl.program_id(1)

    @pl.when(ci == 0)
    def _init():
        m_run[...] = jnp.full(m_run.shape, _NEG_BIG, jnp.float32)
        l_run[...] = jnp.zeros(l_run.shape, jnp.float32)
        pos_dot[...] = jnp.zeros(pos_dot.shape, jnp.float32)

    a = a_ref[...]                                       # [TM, D], pre-scaled by 1/T
    # [D, TN] contrast tile: slice of the VMEM-resident slab or the streamed block.
    c = c_ref[ci] if contrast_resident else c_ref[0]
    # Canonical [M,K]x[K,N] MXU contraction, f32 accumulation.
    s = jax.lax.dot_general(a, c, (((1,), (0,)), ((), ())),
                            preferred_element_type=jnp.float32)   # [TM, TN]
    tm, tn = s.shape

    bias = col_bias_ref[...]                             # [1, TN]: 0 valid / -1e30 padded

    # Self-exclusion: global column index == global row index.
    diff = (jax.lax.broadcasted_iota(jnp.int32, (tm, tn), 1)
            - jax.lax.broadcasted_iota(jnp.int32, (tm, tn), 0))
    is_self = diff == (ri * tm - ci * tn)

    # Denominator logits: padded columns and the self column pushed to -inf.
    s_den = jnp.where(is_self, jnp.float32(_NEG_BIG), s + bias)

    # Positive pairs: same class id and not self.  Padded columns carry class ids that
    # never match a real row id, so no extra validity test is needed here.
    pos_mask = jnp.logical_and(row_lbl_ref[...] == col_lbl_ref[...],
                               jnp.logical_not(is_self))
    pos_dot[...] += jnp.sum(jnp.where(pos_mask, s, jnp.float32(0.0)),
                            axis=1, keepdims=True)

    # Online (streaming) log-sum-exp over the denominator columns.
    m_prev = m_run[...]
    m_new = jnp.maximum(m_prev, jnp.max(s_den, axis=1, keepdims=True))
    l_run[...] = (l_run[...] * jnp.exp(m_prev - m_new)
                  + jnp.sum(jnp.exp(s_den - m_new), axis=1, keepdims=True))
    m_run[...] = m_new

    @pl.when(ci == pl.num_programs(1) - 1)
    def _finalize():
        lse = m_run[...] + jnp.log(l_run[...])
        # mean log-prob over positives.  Rows without positives give NaN exactly like
        # the PyTorch reference (0/0), intentionally unguarded.
        out_ref[...] = jnp.float32(scale) * (pos_dot[...] / pos_cnt_ref[...] - lse)


def _round_up(x, m):
    return ((x + m - 1) // m) * m


def _class_ids(labels, bsz):
    """Dense int32 class ids preserving label-equality structure (== batch_label_vocab)."""
    lab = jnp.asarray(labels).reshape(bsz, -1)
    eq = jnp.all(lab[:, None, :] == lab[None, :, :], axis=-1)   # [bsz, bsz]
    return jnp.argmax(eq, axis=1).astype(jnp.int32)             # index of first equal label


def _pick_tiles(anchor_n, n_total):
    # Keep >= 2 row tiles for mid-size batches so the "parallel" axis can feed both
    # TensorCores on v7x; 256-wide row tiles only for large anchor counts.
    if anchor_n >= 512:
        tm = 256
    elif anchor_n >= 128:
        tm = 128
    else:
        tm = _round_up(max(anchor_n, 8), 8)
    tn = 256 if n_total >= 256 else 128
    return tm, tn


def supcon_loss2(features, labels=None, mask=None,
                 temperature=0.07, contrast_mode='all', base_temperature=0.07,
                 matmul_dtype=jnp.bfloat16, contrast_resident=None):
    """JAX/Pallas equivalent of SupConLoss2.forward."""
    if features.ndim < 3:
        raise ValueError('`features` needs to be [bsz, n_views, ...]')
    if features.ndim > 3:
        features = features.reshape(features.shape[0], features.shape[1], -1)
    bsz, n_views, d = features.shape

    if labels is not None and mask is not None:
        raise ValueError('Cannot define both `labels` and `mask`')
    if mask is not None:
        # TODO(synk): arbitrary / asymmetric [bsz, bsz] masks are not expressible as
        # per-sample class ids; only the labels / SimCLR paths run through the kernel.
        raise NotImplementedError('explicit `mask` is not supported by the Pallas kernel')
    if labels is None:
        ids = jnp.arange(bsz, dtype=jnp.int32)                  # SimCLR: mask = eye(bsz)
    else:
        labels = jnp.asarray(labels)
        if labels.shape[0] != bsz:
            raise ValueError('Num of labels does not match num of features')
        ids = _class_ids(labels, bsz)

    n_total = n_views * bsz
    if n_total < 2:
        raise ValueError('need at least 2 contrast samples')

    # torch.cat(torch.unbind(features, 1), 0): view-major row order.
    contrast = jnp.transpose(features, (1, 0, 2)).reshape(n_total, d).astype(jnp.float32)
    col_ids = jnp.tile(ids, n_views)                            # row j -> sample j % bsz

    if contrast_mode == 'one':
        anchor_n = bsz
    elif contrast_mode == 'all':
        anchor_n = n_total
    else:
        raise ValueError('Unknown mode: {}'.format(contrast_mode))
    anchor = contrast[:anchor_n]                                # view-0 rows for 'one'
    row_ids = col_ids[:anchor_n]

    inv_temp = 1.0 / float(temperature)
    scale = -(float(temperature) / float(base_temperature))

    # ---- tiling / padding -------------------------------------------------
    tm, tn = _pick_tiles(anchor_n, n_total)
    a_pad = _round_up(anchor_n, tm)
    n_pad = _round_up(n_total, tn)
    n_tiles = n_pad // tn

    feat_dtype = jnp.float32 if matmul_dtype is None else jnp.dtype(matmul_dtype)
    itemsize = jnp.dtype(feat_dtype).itemsize

    # Anchor: fold 1/temperature in before the (optional) bf16 cast.
    anchor_p = jnp.zeros((a_pad, d), feat_dtype).at[:anchor_n].set(
        (anchor * jnp.float32(inv_temp)).astype(feat_dtype))
    # Contrast: pre-transposed, lane-dense [n_tiles, D, TN] tiles.
    contrast_td = jnp.zeros((d, n_pad), feat_dtype).at[:, :n_total].set(
        contrast.T.astype(feat_dtype))
    contrast_tiles = contrast_td.reshape(d, n_tiles, tn).transpose(1, 0, 2)

    # Per-row / per-column metadata (tiny).
    row_lbl = jnp.full((a_pad, 1), -1, jnp.int32).at[:anchor_n, 0].set(row_ids)
    col_lbl = jnp.full((1, n_pad), -2, jnp.int32).at[0, :n_total].set(col_ids)
    col_bias = jnp.full((1, n_pad), _NEG_BIG, jnp.float32).at[0, :n_total].set(0.0)
    # Precomputed positive counts: (#same-class contrast rows) - 1 (self excluded).
    col_counts = jnp.zeros((bsz,), jnp.float32).at[col_ids].add(1.0)
    pos_cnt = jnp.ones((a_pad, 1), jnp.float32).at[:anchor_n, 0].set(
        col_counts[row_ids] - 1.0)

    # ---- contrast residency & VMEM budget ----------------------------------
    slab_bytes = n_pad * d * itemsize
    if contrast_resident is None:
        # Conservative: the pipeline may double-buffer the slab; keep 2*slab <= 16 MiB
        # so it fits comfortably on v7x (64 MiB physical) and within raised scoped VMEM.
        contrast_resident = slab_bytes <= (8 << 20)

    if contrast_resident:
        c_spec = pl.BlockSpec((n_tiles, d, tn), lambda ri, ci: (0, 0, 0))
        c_buf_bytes = 2 * slab_bytes
    else:
        c_spec = pl.BlockSpec((1, d, tn), lambda ri, ci: (ci, 0, 0))
        c_buf_bytes = 2 * d * tn * itemsize

    vmem_est = (c_buf_bytes + 2 * tm * d * itemsize + 8 * tm * tn * 4 + (4 << 20))
    vmem_limit = int(min(max(vmem_est, 24 << 20), 56 << 20))

    kernel = functools.partial(_supcon_kernel, scale=scale,
                               contrast_resident=bool(contrast_resident))

    per_row = pl.pallas_call(
        kernel,
        out_shape=jax.ShapeDtypeStruct((a_pad, 1), jnp.float32),
        grid_spec=pltpu.PrefetchScalarGridSpec(
            num_scalar_prefetch=0,
            grid=(a_pad // tm, n_pad // tn),
            in_specs=[
                pl.BlockSpec((tm, 1), lambda ri, ci: (ri, 0)),   # anchor class ids
                pl.BlockSpec((1, tn), lambda ri, ci: (0, ci)),   # contrast class ids
                pl.BlockSpec((1, tn), lambda ri, ci: (0, ci)),   # column pad bias
                pl.BlockSpec((tm, 1), lambda ri, ci: (ri, 0)),   # positive counts
                pl.BlockSpec((tm, d), lambda ri, ci: (ri, 0)),   # anchor features (scaled)
                c_spec,                                          # contrast [n_tiles,D,TN]
            ],
            out_specs=pl.BlockSpec((tm, 1), lambda ri, ci: (ri, 0)),
            scratch_shapes=[pltpu.VMEM((tm, 1), jnp.float32)] * 3,
        ),
        compiler_params=pltpu.CompilerParams(
            dimension_semantics=("parallel", "arbitrary"),
            vmem_limit_bytes=vmem_limit),
    )(row_lbl, col_lbl, col_bias, pos_cnt, anchor_p, contrast_tiles)

    # loss.view(anchor_count, batch_size).mean() == mean over the anchor_n real rows.
    return jnp.mean(per_row[:anchor_n, 0])


def _reference_supcon(features, labels=None, temperature=0.07, base_temperature=0.07):
    """Pure-JAX reference matching the PyTorch module (contrast_mode='all')."""
    bsz, n_views, d = features.shape
    if labels is None:
        mask = jnp.eye(bsz, dtype=jnp.float32)
    else:
        lab = jnp.asarray(labels).reshape(-1, 1)
        mask = (lab == lab.T).astype(jnp.float32)
    cf = jnp.transpose(features, (1, 0, 2)).reshape(n_views * bsz, d)
    adc = jnp.matmul(cf, cf.T) / temperature
    logits = adc - jnp.max(adc, axis=1, keepdims=True)
    mask = jnp.tile(mask, (n_views, n_views))
    n = n_views * bsz
    logits_mask = 1.0 - jnp.eye(n, dtype=jnp.float32)
    mask = mask * logits_mask
    exp_logits = jnp.exp(logits) * logits_mask
    log_prob = logits - jnp.log(jnp.sum(exp_logits, axis=1, keepdims=True))
    mlpp = jnp.sum(mask * log_prob, axis=1) / jnp.sum(mask, axis=1)
    loss = -(temperature / base_temperature) * mlpp
    return jnp.mean(loss)


if __name__ == "__main__":
    key = jax.random.PRNGKey(0)
    k1, k2 = jax.random.split(key)

    # 1) SimCLR (no labels) — small single-tile case, f32 MXU path, tight tolerance.
    bsz, n_views, d = 8, 2, 32
    feats = jax.random.normal(k1, (bsz, n_views, d), dtype=jnp.float32)
    feats = feats / jnp.linalg.norm(feats, axis=-1, keepdims=True)
    loss0 = jax.block_until_ready(supcon_loss2(feats, matmul_dtype=jnp.float32))
    ref0 = _reference_supcon(feats)
    assert jnp.allclose(loss0, ref0, atol=1e-4, rtol=1e-4), (loss0, ref0)

    # 2) Supervised (labels), f32 path, forced streamed-contrast variant.
    labels = jnp.array([0, 1, 0, 1, 2, 2, 3, 3], dtype=jnp.int32)
    loss1 = jax.block_until_ready(
        supcon_loss2(feats, labels=labels, matmul_dtype=jnp.float32,
                     contrast_resident=False))
    ref1 = _reference_supcon(feats, labels=labels)
    assert jnp.allclose(loss1, ref1, atol=1e-4, rtol=1e-4), (loss1, ref1)

    # 3) Multi-tile case (2x2 grid) — streaming LSE, padding, parallel row axis; f32.
    bsz2, nv2, d2 = 96, 2, 64
    feats2 = jax.random.normal(k2, (bsz2, nv2, d2), dtype=jnp.float32)
    feats2 = feats2 / jnp.linalg.norm(feats2, axis=-1, keepdims=True)
    labels2 = jnp.arange(bsz2, dtype=jnp.int32) % 5
    loss2 = jax.block_until_ready(
        supcon_loss2(feats2, labels=labels2, matmul_dtype=jnp.float32))
    ref2 = _reference_supcon(feats2, labels=labels2)
    assert jnp.allclose(loss2, ref2, atol=1e-4, rtol=1e-4), (loss2, ref2)

    # 4) Default path (bf16 MXU feed, f32 accumulation) — looser tolerance.
    loss3 = jax.block_until_ready(supcon_loss2(feats2, labels=labels2))
    assert jnp.allclose(loss3, ref2, atol=1e-1, rtol=5e-2), (loss3, ref2)

    print("KERNEL_OK")
</pallas_src>

<mosaic_0001>
module attributes {stable_mosaic.version = 11 : i64} {
  func.func @_supcon_kernel(%arg0: i32, %arg1: i32, %arg2: memref<16x1xi32, #tpu.memory_space<vmem>>, %arg3: memref<1x128xi32, #tpu.memory_space<vmem>>, %arg4: memref<1x128xf32, #tpu.memory_space<vmem>>, %arg5: memref<16x1xf32, #tpu.memory_space<vmem>>, %arg6: memref<16x32xf32, #tpu.memory_space<vmem>>, %arg7: memref<1x32x128xf32, #tpu.memory_space<vmem>>, %arg8: memref<16x1xf32, #tpu.memory_space<vmem>>, %arg9: memref<16x1xf32, #tpu.memory_space<vmem>>, %arg10: memref<16x1xf32, #tpu.memory_space<vmem>>, %arg11: memref<16x1xf32, #tpu.memory_space<vmem>>) attributes {dimension_semantics = [#tpu.dimension_semantics<parallel>, #tpu.dimension_semantics<arbitrary>], iteration_bounds = array<i64: 1, 1>, scalar_prefetch = 0 : i64, scratch_operands = 3 : i64, tpu.core_type = #tpu.core_type<tc>, window_params = [{transform_indices = @transform_0, window_bounds = array<i64: 16, 1>}, {transform_indices = @transform_1, window_bounds = array<i64: 1, 128>}, {transform_indices = @transform_2, window_bounds = array<i64: 1, 128>}, {transform_indices = @transform_3, window_bounds = array<i64: 16, 1>}, {transform_indices = @transform_4, window_bounds = array<i64: 16, 32>}, {pipeline_mode = #tpu.pipeline_mode<synchronous>, transform_indices = @transform_5, window_bounds = array<i64: 1, 32, 128>}, {transform_indices = @transform_6, window_bounds = array<i64: 16, 1>}]} {
    %c0_i32 = arith.constant 0 : i32
    %0 = arith.cmpi eq, %arg1, %c0_i32 : i32
    %1 = arith.extui %0 : i1 to i32
    %c0_i32_0 = arith.constant 0 : i32
    %2 = arith.cmpi ne, %1, %c0_i32_0 : i32
    scf.if %2 {
      %cst_30 = arith.constant -1.000000e+30 : f32
      %54 = vector.broadcast %cst_30 : f32 to vector<16x1xf32>
      %c0_31 = arith.constant 0 : index
      %c0_32 = arith.constant 0 : index
      %55 = vector.load %arg9[%c0_31, %c0_32] : memref<16x1xf32, #tpu.memory_space<vmem>>, vector<16x1xf32>
      tpu.vector_store %arg9[%c0_31, %c0_32], %54 {strides = array<i32>} : memref<16x1xf32, #tpu.memory_space<vmem>>, vector<16x1xf32>,
      %cst_33 = arith.constant 0.000000e+00 : f32
      %56 = vector.broadcast %cst_33 : f32 to vector<16x1xf32>
      %c0_34 = arith.constant 0 : index
      %c0_35 = arith.constant 0 : index
      %57 = vector.load %arg10[%c0_34, %c0_35] : memref<16x1xf32, #tpu.memory_space<vmem>>, vector<16x1xf32>
      tpu.vector_store %arg10[%c0_34, %c0_35], %56 {strides = array<i32>} : memref<16x1xf32, #tpu.memory_space<vmem>>, vector<16x1xf32>,
      %cst_36 = arith.constant 0.000000e+00 : f32
      %58 = vector.broadcast %cst_36 : f32 to vector<16x1xf32>
      %c0_37 = arith.constant 0 : index
      %c0_38 = arith.constant 0 : index
      %59 = vector.load %arg11[%c0_37, %c0_38] : memref<16x1xf32, #tpu.memory_space<vmem>>, vector<16x1xf32>
      tpu.vector_store %arg11[%c0_37, %c0_38], %58 {strides = array<i32>} : memref<16x1xf32, #tpu.memory_space<vmem>>, vector<16x1xf32>,
    } else {
    }
    %c0 = arith.constant 0 : index
    %c0_1 = arith.constant 0 : index
    %3 = vector.load %arg6[%c0, %c0_1] : memref<16x32xf32, #tpu.memory_space<vmem>>, vector<16x32xf32>
    %4 = arith.index_cast %arg1 : i32 to index
    %c0_2 = arith.constant 0 : index
    %c0_3 = arith.constant 0 : index
    %5 = vector.load %arg7[%4, %c0_2, %c0_3] : memref<1x32x128xf32, #tpu.memory_space<vmem>>, vector<1x32x128xf32>
    %6 = vector.shape_cast %5 : vector<1x32x128xf32> to vector<32x128xf32>
    %cst = arith.constant dense<0.000000e+00> : vector<16x128xf32>
    %7 = tpu.matmul %3, %6, %cst {dimension_numbers = #tpu.dot_dimension_numbers<[1], [0], [0], [1], [0, 0, 1, 1], [], []>} : vector<16x32xf32>, vector<32x128xf32>, vector<16x128xf32> -> vector<16x128xf32>
    %c0_4 = arith.constant 0 : index
    %c0_5 = arith.constant 0 : index
    %8 = vector.load %arg4[%c0_4, %c0_5] : memref<1x128xf32, #tpu.memory_space<vmem>>, vector<1x128xf32>
    %9 = tpu.iota {dimensions = array<i32: 1>} : vector<16x128xi32>
    %10 = tpu.iota {dimensions = array<i32: 0>} : vector<16x128xi32>
    %11 = arith.subi %9, %10 : vector<16x128xi32>
    %c16_i32 = arith.constant 16 : i32
    %12 = arith.muli %arg0, %c16_i32 : i32
    %c128_i32 = arith.constant 128 : i32
    %13 = arith.muli %arg1, %c128_i32 : i32
    %14 = arith.subi %12, %13 : i32
    %15 = vector.broadcast %14 : i32 to vector<16x128xi32>
    %16 = arith.cmpi eq, %11, %15 : vector<16x128xi32>
    %17 = vector.broadcast %8 : vector<1x128xf32> to vector<16x128xf32>
    %18 = arith.addf %7, %17 : vector<16x128xf32>
    %cst_6 = arith.constant -1.000000e+30 : f32
    %19 = vector.broadcast %cst_6 : f32 to vector<16x128xf32>
    %20 = arith.select %16, %19, %18 : vector<16x128xi1>, vector<16x128xf32>
    %c0_7 = arith.constant 0 : index
    %c0_8 = arith.constant 0 : index
    %21 = vector.load %arg2[%c0_7, %c0_8] : memref<16x1xi32, #tpu.memory_space<vmem>>, vector<16x1xi32>
    %c0_9 = arith.constant 0 : index
    %c0_10 = arith.constant 0 : index
    %22 = vector.load %arg3[%c0_9, %c0_10] : memref<1x128xi32, #tpu.memory_space<vmem>>, vector<1x128xi32>
    %23 = vector.broadcast %21 : vector<16x1xi32> to vector<16x128xi32>
    %24 = vector.broadcast %22 : vector<1x128xi32> to vector<16x128xi32>
    %25 = arith.cmpi eq, %23, %24 : vector<16x128xi32>
    %cst_11 = arith.constant dense<true> : vector<16x128xi1>
    %26 = arith.xori %16, %cst_11 : vector<16x128xi1>
    %27 = arith.andi %25, %26 : vector<16x128xi1>
    %c0_12 = arith.constant 0 : index
    %c0_13 = arith.constant 0 : index
    %28 = vector.load %arg11[%c0_12, %c0_13] : memref<16x1xf32, #tpu.memory_space<vmem>>, vector<16x1xf32>
    %cst_14 = arith.constant 0.000000e+00 : f32
    %29 = vector.broadcast %cst_14 : f32 to vector<16x128xf32>
    %30 = arith.select %27, %7, %29 : vector<16x128xi1>, vector<16x128xf32>
    %cst_15 = arith.constant dense<0.000000e+00> : vector<16xf32>
    %31 = vector.multi_reduction <add>, %30, %cst_15 [1] : vector<16x128xf32> to vector<16xf32>
    %32 = vector.shape_cast %31 : vector<16xf32> to vector<16x1xf32>
    %33 = arith.addf %28, %32 : vector<16x1xf32>
    %c0_16 = arith.constant 0 : index
    %c0_17 = arith.constant 0 : index
    %34 = vector.load %arg11[%c0_16, %c0_17] : memref<16x1xf32, #tpu.memory_space<vmem>>, vector<16x1xf32>
    tpu.vector_store %arg11[%c0_16, %c0_17], %33 {strides = array<i32>} : memref<16x1xf32, #tpu.memory_space<vmem>>, vector<16x1xf32>,
    %c0_18 = arith.constant 0 : index
    %c0_19 = arith.constant 0 : index
    %35 = vector.load %arg9[%c0_18, %c0_19] : memref<16x1xf32, #tpu.memory_space<vmem>>, vector<16x1xf32>
    %cst_20 = arith.constant dense<0xFF800000> : vector<16xf32>
    %36 = vector.multi_reduction <maximumf>, %20, %cst_20 [1] : vector<16x128xf32> to vector<16xf32>
    %37 = vector.shape_cast %36 : vector<16xf32> to vector<16x1xf32>
    %38 = arith.maximumf %35, %37 : vector<16x1xf32>
    %c0_21 = arith.constant 0 : index
    %c0_22 = arith.constant 0 : index
    %39 = vector.load %arg10[%c0_21, %c0_22] : memref<16x1xf32, #tpu.memory_space<vmem>>, vector<16x1xf32>
    %40 = arith.subf %35, %38 : vector<16x1xf32>
    %41 = math.exp %40 : vector<16x1xf32>
    %42 = arith.mulf %39, %41 : vector<16x1xf32>
    %43 = vector.broadcast %38 : vector<16x1xf32> to vector<16x128xf32>
    %44 = arith.subf %20, %43 : vector<16x128xf32>
    %45 = math.exp %44 : vector<16x128xf32>
    %cst_23 = arith.constant dense<0.000000e+00> : vector<16xf32>
    %46 = vector.multi_reduction <add>, %45, %cst_23 [1] : vector<16x128xf32> to vector<16xf32>
    %47 = vector.shape_cast %46 : vector<16xf32> to vector<16x1xf32>
    %48 = arith.addf %42, %47 : vector<16x1xf32>
    %c0_24 = arith.constant 0 : index
    %c0_25 = arith.constant 0 : index
    %49 = vector.load %arg10[%c0_24, %c0_25] : memref<16x1xf32, #tpu.memory_space<vmem>>, vector<16x1xf32>
    tpu.vector_store %arg10[%c0_24, %c0_25], %48 {strides = array<i32>} : memref<16x1xf32, #tpu.memory_space<vmem>>, vector<16x1xf32>,
    %c0_26 = arith.constant 0 : index
    %c0_27 = arith.constant 0 : index
    %50 = vector.load %arg9[%c0_26, %c0_27] : memref<16x1xf32, #tpu.memory_space<vmem>>, vector<16x1xf32>
    tpu.vector_store %arg9[%c0_26, %c0_27], %38 {strides = array<i32>} : memref<16x1xf32, #tpu.memory_space<vmem>>, vector<16x1xf32>,
    %c0_i32_28 = arith.constant 0 : i32
    %51 = arith.cmpi eq, %arg1, %c0_i32_28 : i32
    %52 = arith.extui %51 : i1 to i32
    %c0_i32_29 = arith.constant 0 : i32
    %53 = arith.cmpi ne, %52, %c0_i32_29 : i32
    scf.if %53 {
      %c0_30 = arith.constant 0 : index
      %c0_31 = arith.constant 0 : index
      %54 = vector.load %arg9[%c0_30, %c0_31] : memref<16x1xf32, #tpu.memory_space<vmem>>, vector<16x1xf32>
      %c0_32 = arith.constant 0 : index
      %c0_33 = arith.constant 0 : index
      %55 = vector.load %arg10[%c0_32, %c0_33] : memref<16x1xf32, #tpu.memory_space<vmem>>, vector<16x1xf32>
      %56 = math.log %55 : vector<16x1xf32>
      %57 = arith.addf %54, %56 : vector<16x1xf32>
      %c0_34 = arith.constant 0 : index
      %c0_35 = arith.constant 0 : index
      %58 = vector.load %arg11[%c0_34, %c0_35] : memref<16x1xf32, #tpu.memory_space<vmem>>, vector<16x1xf32>
      %c0_36 = arith.constant 0 : index
      %c0_37 = arith.constant 0 : index
      %59 = vector.load %arg5[%c0_36, %c0_37] : memref<16x1xf32, #tpu.memory_space<vmem>>, vector<16x1xf32>
      %60 = arith.divf %58, %59 : vector<16x1xf32>
      %61 = arith.subf %60, %57 : vector<16x1xf32>
      %cst_38 = arith.constant -1.000000e+00 : f32
      %62 = vector.broadcast %cst_38 : f32 to vector<16x1xf32>
      %63 = arith.mulf %62, %61 : vector<16x1xf32>
      %c0_39 = arith.constant 0 : index
      %c0_40 = arith.constant 0 : index
      %64 = vector.load %arg8[%c0_39, %c0_40] : memref<16x1xf32, #tpu.memory_space<vmem>>, vector<16x1xf32>
      tpu.vector_store %arg8[%c0_39, %c0_40], %63 {strides = array<i32>} : memref<16x1xf32, #tpu.memory_space<vmem>>, vector<16x1xf32>,
    } else {
    }
    return
  }
  func.func @transform_0(%arg0: i32, %arg1: i32) -> (i32, i32) {
    %c0_i32 = arith.constant 0 : i32
    %c0_i32_0 = arith.constant 0 : i32
    return %arg0, %c0_i32 : i32, i32
  }
  func.func @transform_1(%arg0: i32, %arg1: i32) -> (i32, i32) {
    %c0_i32 = arith.constant 0 : i32
    %c0_i32_0 = arith.constant 0 : i32
    return %c0_i32, %arg1 : i32, i32
  }
  func.func @transform_2(%arg0: i32, %arg1: i32) -> (i32, i32) {
    %c0_i32 = arith.constant 0 : i32
    %c0_i32_0 = arith.constant 0 : i32
    return %c0_i32, %arg1 : i32, i32
  }
  func.func @transform_3(%arg0: i32, %arg1: i32) -> (i32, i32) {
    %c0_i32 = arith.constant 0 : i32
    %c0_i32_0 = arith.constant 0 : i32
    return %arg0, %c0_i32 : i32, i32
  }
  func.func @transform_4(%arg0: i32, %arg1: i32) -> (i32, i32) {
    %c0_i32 = arith.constant 0 : i32
    %c0_i32_0 = arith.constant 0 : i32
    return %arg0, %c0_i32 : i32, i32
  }
  func.func @transform_5(%arg0: i32, %arg1: i32) -> (i32, i32, i32) {
    %c0_i32 = arith.constant 0 : i32
    %c0_i32_0 = arith.constant 0 : i32
    %c0_i32_1 = arith.constant 0 : i32
    %c0_i32_2 = arith.constant 0 : i32
    return %c0_i32, %c0_i32_0, %c0_i32_1 : i32, i32, i32
  }
  func.func @transform_6(%arg0: i32, %arg1: i32) -> (i32, i32) {
    %c0_i32 = arith.constant 0 : i32
    %c0_i32_0 = arith.constant 0 : i32
    return %arg0, %c0_i32 : i32, i32
  }
}

</mosaic_0001>

<bundles_post_ra>
// kernel: tpu_custom_call.1
= control target key start
LH: loop header
LB: loop body
LE: loop exit
PB: predicated region body
PF: predicated region fallthrough
CT: control target
= control target key end

     0   :  { %vm42_vm0 = vcmask 261120   ;;  %v306_v8 = vmov 0   ;;  %vm27_vm1 = vcmask 7168   ;;  %v307_v9 = vmov -1e+30   ;;  %s419_s5 = inlined_call_operand.vmem [shape: f32[1,32,128], index: 5, kind: input, shape index: {}]   ;;  %s420_s4 = inlined_call_operand.vmem [shape: f32[16,32], index: 4, kind: input, shape index: {}]   ;;  %s421_s2 = inlined_call_operand.vmem [shape: f32[1,128], index: 2, kind: input, shape index: {}]   ;;  %s422_s0 = inlined_call_operand.vmem [shape: s32[16,1], index: 0, kind: input, shape index: {}]   ;;  %s423_s1 = inlined_call_operand.vmem [shape: s32[1,128], index: 1, kind: input, shape index: {}]   ;;  %s424_s3 = inlined_call_operand.vmem [shape: f32[16,1], index: 3, kind: input, shape index: {}]   ;;  %s425_s6 = inlined_call_operand.vmem [shape: f32[16,1], index: 6, kind: output, shape index: {}]  }
   0x1   :  { %v38_v0 = vld [vmem:[%s419_s5] sm:$0xff]  ;;  %v39_v1 = vld [vmem:[%s419_s5 + $0x8] sm:$0xff]  ;;  %v40_v2 = vld [vmem:[%s419_s5 + $0x10] sm:$0xff]  ;;  %289 = vset.pattern.permute.xlu0 %v306_v8  ;;  %288 = vset.pattern.permute.xlu1 %v306_v8  ;;  %28 = vst.msk [vmem:[#allocation2] sm:$0xff] %vm27_vm1, %v307_v9  ;;  %v125_v10 = vlaneseq  ;;  %v308_v26 = vmov 0.0   ;;  %vm309_vm4 = vmmov 1  }
   0x2   :  { %v276_v3 = vpack.c.bf16 %v39_v1, %v38_v0  ;;  %v41_v4 = vld [vmem:[%s419_s5 + $0x18] sm:$0xff]  ;;  %v34_v5 = vld [vmem:[%s420_s4] sm:$0xff]  ;;  %v35_v7 = vld [vmem:[%s420_s4 + $0x8] sm:$0xff]  ;;  %29 = vst.msk [vmem:[#allocation2 + $0x8] sm:$0xff] %vm27_vm1, %v307_v9 }
   0x3   :  { %v280_v6 = vpack.c.bf16 %v41_v4, %v40_v2  ;;  %273 = vmatprep.mubr.msk.f32.mxu0 %vm42_vm0, %v34_v5  ;;  %v126_v11 = vand.u32 127, %v125_v10  ;;  %v128_v12 = vshrl.u32 %v125_v10, 7  ;;  %v257_v15 = vld [vmem:[%s421_s2] ss:$0 sm:$0xff]  ;;  %32 = vst.msk [vmem:[#allocation4] sm:$0xff] %vm27_vm1, %v308_v26  ;;  %30 = vst.msk [vmem:[#allocation3] sm:$0xff] %vm27_vm1, %v308_v26 }
   0x4   :  { %277 = vmatprep.subr.bf16.mxu0 %v276_v3  ;;  %v148_v25 = vld [vmem:[%s422_s0] sm:$0xff]  ;;  %31 = vst.msk [vmem:[#allocation3 + $0x8] sm:$0xff] %vm27_vm1, %v308_v26  ;;  %33 = vst.msk [vmem:[#allocation4 + $0x8] sm:$0xff] %vm27_vm1, %v308_v26  ;;  %v149_v35 = vld [vmem:[%s422_s0 + $0x8] sm:$0xff] }
   0x5   :  { %279 = vmatpush3.bf16.msra.mxu0 %v276_v3  ;;  %v130_v13 = vsub.s32 %v126_v11, %v128_v12  ;;  %v129_v14 = vadd.s32 8, %v128_v12  ;;  %v258_v36 = vld [vmem:[%s423_s1] ss:$0 sm:$0xff]  ;;  %v240_v5 = vld [vmem:[%s424_s3 + $0x8] sm:$0xff] }
   0x6   :  { %281 = vmatprep.subr.bf16.mxu0 %v280_v6  ;;  %v239_v1 = vld [vmem:[%s424_s3] sm:$0xff] }
   0x7   :  { %vm368_vm2 = vcmp.eq.s32.totalorder %v130_v13, 0  ;;  %v131_v19 = vsub.s32 %v126_v11, %v129_v14 }
   0x8   :  { %v180_v27 = vld [vmem:[#allocation2] sm:$0xff]  ;;  %vm163_vm5 = vmxor %vm368_vm2, %vm309_vm4 }
   0x9   :  { %283 = vmatpush3.bf16.msra.mxu0 %v280_v6  ;;  %vm374_vm3 = vcmp.eq.s32.totalorder %v131_v19, 0  ;;  %v181_v30 = vld [vmem:[#allocation2 + $0x8] sm:$0xff] }
   0xa   :  { %vm164_vm9 = vmxor %vm374_vm3, %vm309_vm4  ;;  %v167_v49 = vld [vmem:[#allocation4] sm:$0xff]  ;;  %v188_v55 = vld [vmem:[#allocation3] sm:$0xff] }
   0xb   :  { %v189_v59 = vld [vmem:[#allocation3 + $0x8] sm:$0xff]  ;;  %v168_v0 = vld [vmem:[#allocation4 + $0x8] sm:$0xff] }
   0xc   :  { %274 = vmatmul.mubr.msk.f32.vlgmr.msra.gmra.mrb[0].mxu0 %vm42_vm0, %v35_v7 }
  0xdf   :  { %v275_v16 = vpop.f32.mrb[0].mxu0 }
  0xe0   :  { %v115_v17 = vpop.f32.mrb[1].mxu0  ;;  %v145_v22 = vadd.f32 %v275_v16, %v257_v15 }
  0xe1   :  { %v144_v20 = vadd.f32 %v257_v15, %v115_v17 }
  0xe2   :  { %v147_v24 = vsel %vm374_vm3, -1e+30, %v145_v22 }
  0xe3   :  { %v146_v21 = vsel %vm368_vm2, -1e+30, %v144_v20 }
  0xe4   :  { %182 = vmax.xlane.f32.xlu0 %v146_v21 }
  0xe8   :  { %184 = vmax.xlane.f32.xlu0 %v147_v24 }
  0xfe   :  { %152 = vperm.xlu0 %289, %v148_v25  }
 0x171   :  { %v183_v28 = vpop.xlane.xlu0 %182 }
 0x172   :  { %v186_v29 = vmax.f32 %v180_v27, %v183_v28 }
 0x174   :  { %v190_v31 = vsub.f32 %v180_v27, %v186_v29  ;;  %222 = vst.msk [vmem:[#allocation2] sm:$0xff] %vm27_vm1, %v186_v29  ;;  %200 = vperm.xlu1 %288, %v186_v29  }
 0x175   :  { %v185_v32 = vpop.xlane.xlu0 %184 }
 0x176   :  { %v187_v33 = vmax.f32 %v181_v30, %v185_v32  ;;  %v192_v52 = vmul.f32 1.442695, %v190_v31 }
 0x178   :  { %v191_v34 = vsub.f32 %v181_v30, %v187_v33  ;;  %223 = vst.msk [vmem:[#allocation2 + $0x8] sm:$0xff] %vm27_vm1, %v187_v33  ;;  %205 = vperm.xlu1 %288, %v187_v33  }
 0x17a   :  { %v194_v53 = vmul.f32 1.442695, %v191_v34 }
 0x17b   :  { %v227_v11 = vld [vmem:[#allocation2] sm:$0xff] }
 0x17c   :  { %155 = vperm.xlu1 %288, %v149_v35  }
 0x17d   :  { %v153_v37 = vpop.permute.xlu0 %152 }
 0x17e   :  { %vm161_vm6 = vcmp.eq.s32.totalorder %v153_v37, %v258_v36 }
 0x17f   :  { %vm165_vm7 = vmand %vm161_vm6, %vm163_vm5  ;;  %v228_v19 = vld [vmem:[#allocation2 + $0x8] sm:$0xff] }
 0x180   :  { %v169_v38 = vsel %vm165_vm7, %v115_v17, 0.0 }
 0x181   :  { %171 = vadd.xlane.f32.xlu0 %v169_v38 }
 0x1f3   :  { %v201_v39 = vpop.permute.xlu1 %200 }
 0x1f4   :  { %v208_v40 = vsub.f32 %v146_v21, %v201_v39 }
 0x1f6   :  { %v210_v41 = vmul.f32 1.442695, %v208_v40 }
 0x1f7   :  { %v206_v42 = vpop.permute.xlu1 %205 }
 0x1f8   :  { %290 = vpow2.f32 %v210_v41  ;;  %v209_v43 = vsub.f32 %v147_v24, %v206_v42 }
 0x1fa   :  { %v212_v44 = vmul.f32 1.442695, %v209_v43 }
 0x1fb   :  { %v156_v45 = vpop.permute.xlu1 %155 }
 0x1fc   :  { %292 = vpow2.f32 %v212_v44  ;;  %vm162_vm8 = vcmp.eq.s32.totalorder %v156_v45, %v258_v36 }
 0x1fd   :  { %vm166_vm10 = vmand %vm162_vm8, %vm164_vm9  ;;  %294 = vpow2.f32 %v192_v52 }
 0x1fe   :  { %v170_v48 = vsel %vm166_vm10, %v275_v16, 0.0  ;;  %296 = vpow2.f32 %v194_v53 }
 0x1ff   :  { %298 = vrcp.f32 %v239_v1 }
 0x202   :  { %v291_v46 = vpop.eup %290 }
 0x203   :  { %214 = vadd.xlane.f32.xlu1 %v291_v46 }
 0x206   :  { %v293_v47 = vpop.eup %292 }
 0x207   :  { %216 = vadd.xlane.f32.xlu1 %v293_v47  ;;  %v295_v54 = vpop.eup %294 }
 0x208   :  { %v196_v56 = vmul.f32 %v295_v54, %v188_v55  ;;  %v297_v57 = vpop.eup %296 }
 0x209   :  { %v197_v61 = vmul.f32 %v297_v57, %v189_v59  ;;  %v299_v7 = vpop.eup %298 }
 0x20b   :  { %173 = vadd.xlane.f32.xlu1 %v170_v48 }
 0x20e   :  { %v172_v50 = vpop.xlane.xlu0 %171 }
 0x20f   :  { %v175_v51 = vadd.f32 %v172_v50, %v167_v49 }
 0x211   :  { %178 = vst.msk [vmem:[#allocation4] sm:$0xff] %vm27_vm1, %v175_v51 }
 0x218   :  { %v237_v9 = vld [vmem:[#allocation4] sm:$0xff] }
 0x219   :  { %v242_v13 = vmul.f32 %v299_v7, %v237_v9 }
 0x290   :  { %v215_v58 = vpop.xlane.xlu1 %214 }
 0x291   :  { %v218_v60 = vadd.f32 %v215_v58, %v196_v56 }
 0x293   :  { %220 = vst.msk [vmem:[#allocation3] sm:$0xff] %vm27_vm1, %v218_v60 }
 0x294   :  { %v217_v62 = vpop.xlane.xlu1 %216 }
 0x295   :  { %v219_v63 = vadd.f32 %v217_v62, %v197_v61 }
 0x297   :  { %221 = vst.msk [vmem:[#allocation3 + $0x8] sm:$0xff] %vm27_vm1, %v219_v63 }
 0x298   :  { %v174_v2 = vpop.xlane.xlu1 %173 }
 0x299   :  { %v176_v3 = vadd.f32 %v174_v2, %v168_v0 }
 0x29a   :  { %v229_v4 = vld [vmem:[#allocation3] sm:$0xff] }
 0x29b   :  { %300 = vlog2.f32 %v229_v4  ;;  %179 = vst.msk [vmem:[#allocation4 + $0x8] sm:$0xff] %vm27_vm1, %v176_v3 }
 0x29c   :  { %302 = vrcp.f32 %v240_v5 }
 0x29e   :  { %v230_v6 = vld [vmem:[#allocation3 + $0x8] sm:$0xff] }
 0x29f   :  { %304 = vlog2.f32 %v230_v6 }
 0x2a2   :  { %v238_v16 = vld [vmem:[#allocation4 + $0x8] sm:$0xff] }
 0x2a5   :  { %v301_v8 = vpop.eup %300 }
 0x2a6   :  { %v232_v10 = vmul.f32 0.6931472, %v301_v8  ;;  %v303_v12 = vpop.eup %302 }
 0x2a7   :  { %v244_v22 = vmul.f32 %v303_v12, %v238_v16 }
 0x2a8   :  { %v235_v14 = vadd.f32 %v232_v10, %v227_v11 }
 0x2a9   :  { %v305_v15 = vpop.eup %304 }
 0x2aa   :  { %v245_v17 = vsub.f32 %v242_v13, %v235_v14  ;;  %v234_v18 = vmul.f32 0.6931472, %v305_v15 }
 0x2ac   :  { %v247_v20 = vmul.f32 -1.0, %v245_v17  ;;  %v236_v21 = vadd.f32 %v234_v18, %v228_v19 }
 0x2ae   :  { %v246_v23 = vsub.f32 %v244_v22, %v236_v21  ;;  %249 = vst.msk [vmem:[%s425_s6] sm:$0xff] %vm27_vm1, %v247_v20 }
 0x2b0   :  { %v248_v24 = vmul.f32 -1.0, %v246_v23 }
 0x2b2   :  { %250 = vst.msk [vmem:[%s425_s6 + $0x8] sm:$0xff] %vm27_vm1, %v248_v24 }

</bundles_post_ra>
